<compile_context>
chip_gen: v7x
topology: tpu7x:2x2x1
jax: 0.10.0
libtpu: 0.0.40
codegen_flags: <defaults>
</compile_context>

<pallas_src>
import functools

import jax
import jax.numpy as jnp
from jax.experimental import pallas as pl
from jax.experimental.pallas import tpu as pltpu


def _round_up(x, m):
    return (x + m - 1) // m * m


def _critic_kernel(sg_ref, act_ref, w1s_ref, w1a_ref, b1_ref, w2_ref, b2_ref,
                   w3_ref, b3_ref, wo_ref, bo_ref, out_ref):
    # Layer 1 (fused concat): (TB,S)@(S,H) + (TB,A)@(A,H) + b1 -> ReLU.
    h = jnp.dot(sg_ref[...], w1s_ref[...], preferred_element_type=jnp.float32)
    h = h + jnp.dot(act_ref[...], w1a_ref[...],
                    preferred_element_type=jnp.float32)
    h = jnp.maximum(h + b1_ref[...], 0.0)
    # Layer 2: (TB,H)@(H,H) + b2 -> ReLU   (f32 accumulate, f32 epilogue).
    h = jnp.dot(h.astype(w2_ref.dtype), w2_ref[...],
                preferred_element_type=jnp.float32)
    h = jnp.maximum(h + b2_ref[...], 0.0)
    # Layer 3: (TB,H)@(H,H) + b3 -> ReLU.
    h = jnp.dot(h.astype(w3_ref.dtype), w3_ref[...],
                preferred_element_type=jnp.float32)
    h = jnp.maximum(h + b3_ref[...], 0.0)
    # Output layer: N=1 matmul replaced by a VPU multiply + XLU lane reduce
    # (wo is a (1, H) f32 row); scalar bias read from SMEM.
    q = jnp.sum(h * wo_ref[...], axis=-1, keepdims=True)
    out_ref[...] = q + bo_ref[0, 0]


@functools.partial(jax.jit, static_argnames=("block_b", "compute_dtype"))
def critic_forward(combine_state_goal, action, params, *, block_b=512,
                   compute_dtype=jnp.float32):
    """Pallas forward pass of the Critic.

    combine_state_goal: (B, S) float32
    action:             (B, A) float32
    params: dict with W1s (S,H), W1a (A,H), b1 (1,H), W2/W3 (H,H), b2/b3 (1,H),
            Wo (1,H), bo (1,1) — weights in (in, out) layout: y = x @ W + b.
    Returns: (B, 1) float32 Q-values.
    """
    B, S = combine_state_goal.shape
    A = action.shape[1]
    H = params["W2"].shape[0]

    # Batch tile: large MXU-friendly tile when the batch is big enough,
    # otherwise just the 8-row-aligned padded batch.
    tb = min(block_b, _round_up(B, 8))
    b_pad = _round_up(B, tb)

    sg = combine_state_goal.astype(compute_dtype)
    act = action.astype(compute_dtype)
    if b_pad != B:
        sg = jnp.pad(sg, ((0, b_pad - B), (0, 0)))
        act = jnp.pad(act, ((0, b_pad - B), (0, 0)))

    # Matmul weights in the compute dtype; biases and the output row stay f32
    # (VPU/epilogue math is kept f32 — matters on v5e which has no bf16 VPU).
    w1s = params["W1s"].astype(compute_dtype)
    w1a = params["W1a"].astype(compute_dtype)
    w2 = params["W2"].astype(compute_dtype)
    w3 = params["W3"].astype(compute_dtype)
    b1, b2, b3 = params["b1"], params["b2"], params["b3"]
    wo, bo = params["Wo"], params["bo"]

    tile_map = lambda i: (i, 0)      # activation / output tiles walk the batch
    const = lambda i: (0, 0)         # weights: constant block -> stay resident

    itemsize = jnp.dtype(compute_dtype).itemsize
    flops = 2 * b_pad * ((S + A) * H + 2 * H * H + H)
    bytes_accessed = (b_pad * (S + A) * itemsize                  # activations in
                      + ((S + A) * H + 2 * H * H) * itemsize      # matmul weights
                      + (4 * H + 1) * 4                           # biases + Wo + bo
                      + b_pad * 4)                                # Q out
    cost = pl.CostEstimate(flops=int(flops), transcendentals=0,
                           bytes_accessed=int(bytes_accessed))

    q = pl.pallas_call(
        _critic_kernel,
        out_shape=jax.ShapeDtypeStruct((b_pad, 1), jnp.float32),
        grid=(b_pad // tb,),
        in_specs=[
            pl.BlockSpec((tb, S), tile_map),
            pl.BlockSpec((tb, A), tile_map),
            pl.BlockSpec((S, H), const),
            pl.BlockSpec((A, H), const),
            pl.BlockSpec((1, H), const),
            pl.BlockSpec((H, H), const),
            pl.BlockSpec((1, H), const),
            pl.BlockSpec((H, H), const),
            pl.BlockSpec((1, H), const),
            pl.BlockSpec((1, H), const),
            pl.BlockSpec((1, 1), const, memory_space=pltpu.MemorySpace.SMEM),
        ],
        out_specs=pl.BlockSpec((tb, 1), tile_map),
        compiler_params=pltpu.CompilerParams(
            # Batch tiles are independent -> shard across TCs (v7x megacore).
            dimension_semantics=("parallel",)),
        cost_estimate=cost,
    )(sg, act, w1s, w1a, b1, w2, b2, w3, b3, wo, bo)
    return q if b_pad == B else q[:B]


def init_critic_params(key, state_plus_goal_size, action_size,
                       hidden_sizes=(256, 256, 256)):
    """PyTorch-style U(-1/sqrt(fan_in), 1/sqrt(fan_in)) init.

    Weights are stored (in_features, out_features). Layer-1's weight is
    pre-split into W1s (state||goal rows) and W1a (action rows) so the kernel
    can fuse the concat; Wo is stored as a (1, H) row for the VPU reduce.
    """
    assert len(hidden_sizes) == 3, "kernel is specialized to 3 hidden layers"
    sizes = [state_plus_goal_size + action_size] + list(hidden_sizes) + [1]
    names = ["1", "2", "3", "o"]
    params = {}
    for n, (fan_in, fan_out) in zip(names, zip(sizes[:-1], sizes[1:])):
        key, kw, kb = jax.random.split(key, 3)
        bound = float(fan_in) ** -0.5
        params[f"W{n}"] = jax.random.uniform(kw, (fan_in, fan_out), jnp.float32,
                                             -bound, bound)
        params[f"b{n}"] = jax.random.uniform(kb, (1, fan_out), jnp.float32,
                                             -bound, bound)
    w1 = params.pop("W1")
    params["W1s"] = w1[:state_plus_goal_size]
    params["W1a"] = w1[state_plus_goal_size:]
    params["Wo"] = params["Wo"].T          # (1, H) row vector
    return params


def critic_reference(combine_state_goal, action, params):
    """Pure-JAX reference (mirrors the PyTorch forward exactly)."""
    x = jnp.concatenate([combine_state_goal, action], axis=-1)
    w1 = jnp.concatenate([params["W1s"], params["W1a"]], axis=0)
    x = jnp.maximum(x @ w1 + params["b1"], 0.0)
    x = jnp.maximum(x @ params["W2"] + params["b2"], 0.0)
    x = jnp.maximum(x @ params["W3"] + params["b3"], 0.0)
    return x @ params["Wo"].T + params["bo"]


if __name__ == "__main__":
    batch = 8
    state_plus_goal_size = 24
    action_size = 8

    key = jax.random.PRNGKey(0)
    kp, ks, ka = jax.random.split(key, 3)

    params = init_critic_params(kp, state_plus_goal_size, action_size)
    sg = jax.random.normal(ks, (batch, state_plus_goal_size), jnp.float32)
    act = jax.random.normal(ka, (batch, action_size), jnp.float32)

    # f32 path (matches the PyTorch module's default dtype).
    q = jax.block_until_ready(critic_forward(sg, act, params))
    q_ref = critic_reference(sg, act, params)
    assert q.shape == (batch, 1)
    assert jnp.allclose(q, q_ref, atol=1e-5, rtol=1e-5), "f32 mismatch vs reference"

    # Larger, non-multiple batch: exercises batch tiling and row padding.
    kb1, kb2 = jax.random.split(jax.random.PRNGKey(1))
    big_b = 600
    sg_big = jax.random.normal(kb1, (big_b, state_plus_goal_size), jnp.float32)
    act_big = jax.random.normal(kb2, (big_b, action_size), jnp.float32)
    q_big = jax.block_until_ready(critic_forward(sg_big, act_big, params))
    q_big_ref = critic_reference(sg_big, act_big, params)
    assert q_big.shape == (big_b, 1)
    assert jnp.allclose(q_big, q_big_ref, atol=1e-5, rtol=1e-5), "tiled mismatch"

    # bf16 weight/activation path (v6e/v7x fast path), f32 accumulation.
    q_bf16 = jax.block_until_ready(
        critic_forward(sg, act, params, compute_dtype=jnp.bfloat16))
    assert q_bf16.shape == (batch, 1)
    assert jnp.allclose(q_bf16, q_ref, atol=5e-2, rtol=5e-2), "bf16 mismatch"

    print("KERNEL_OK")
</pallas_src>

<mosaic_0001>
module attributes {stable_mosaic.version = 11 : i64} {
  func.func @_critic_kernel(%arg0: i32, %arg1: memref<8x24xf32, #tpu.memory_space<vmem>>, %arg2: memref<8x8xf32, #tpu.memory_space<vmem>>, %arg3: memref<24x256xf32, #tpu.memory_space<vmem>>, %arg4: memref<8x256xf32, #tpu.memory_space<vmem>>, %arg5: memref<1x256xf32, #tpu.memory_space<vmem>>, %arg6: memref<256x256xf32, #tpu.memory_space<vmem>>, %arg7: memref<1x256xf32, #tpu.memory_space<vmem>>, %arg8: memref<256x256xf32, #tpu.memory_space<vmem>>, %arg9: memref<1x256xf32, #tpu.memory_space<vmem>>, %arg10: memref<1x256xf32, #tpu.memory_space<vmem>>, %arg11: memref<1x1xf32, #tpu.memory_space<smem>>, %arg12: memref<8x1xf32, #tpu.memory_space<vmem>>) attributes {dimension_semantics = [#tpu.dimension_semantics<parallel>], iteration_bounds = array<i64: 1>, scalar_prefetch = 0 : i64, scratch_operands = 0 : i64, tpu.core_type = #tpu.core_type<tc>, window_params = [{transform_indices = @transform_0, window_bounds = array<i64: 8, 24>}, {transform_indices = @transform_1, window_bounds = array<i64: 8, 8>}, {pipeline_mode = #tpu.pipeline_mode<synchronous>, transform_indices = @transform_2, window_bounds = array<i64: 24, 256>}, {pipeline_mode = #tpu.pipeline_mode<synchronous>, transform_indices = @transform_3, window_bounds = array<i64: 8, 256>}, {pipeline_mode = #tpu.pipeline_mode<synchronous>, transform_indices = @transform_4, window_bounds = array<i64: 1, 256>}, {pipeline_mode = #tpu.pipeline_mode<synchronous>, transform_indices = @transform_5, window_bounds = array<i64: 256, 256>}, {pipeline_mode = #tpu.pipeline_mode<synchronous>, transform_indices = @transform_6, window_bounds = array<i64: 1, 256>}, {pipeline_mode = #tpu.pipeline_mode<synchronous>, transform_indices = @transform_7, window_bounds = array<i64: 256, 256>}, {pipeline_mode = #tpu.pipeline_mode<synchronous>, transform_indices = @transform_8, window_bounds = array<i64: 1, 256>}, {pipeline_mode = #tpu.pipeline_mode<synchronous>, transform_indices = @transform_9, window_bounds = array<i64: 1, 256>}, {transform_indices = @transform_10, window_bounds = array<i64: 1, 1>}, {transform_indices = @transform_11, window_bounds = array<i64: 8, 1>}]} {
    %c0 = arith.constant 0 : index
    %c0_0 = arith.constant 0 : index
    %0 = vector.load %arg1[%c0, %c0_0] : memref<8x24xf32, #tpu.memory_space<vmem>>, vector<8x24xf32>
    %c0_1 = arith.constant 0 : index
    %c0_2 = arith.constant 0 : index
    %1 = vector.load %arg3[%c0_1, %c0_2] : memref<24x256xf32, #tpu.memory_space<vmem>>, vector<24x256xf32>
    %cst = arith.constant dense<0.000000e+00> : vector<8x256xf32>
    %2 = tpu.matmul %0, %1, %cst {dimension_numbers = #tpu.dot_dimension_numbers<[1], [0], [0], [1], [0, 0, 1, 1], [], []>} : vector<8x24xf32>, vector<24x256xf32>, vector<8x256xf32> -> vector<8x256xf32>
    %c0_3 = arith.constant 0 : index
    %c0_4 = arith.constant 0 : index
    %3 = vector.load %arg2[%c0_3, %c0_4] : memref<8x8xf32, #tpu.memory_space<vmem>>, vector<8x8xf32>
    %c0_5 = arith.constant 0 : index
    %c0_6 = arith.constant 0 : index
    %4 = vector.load %arg4[%c0_5, %c0_6] : memref<8x256xf32, #tpu.memory_space<vmem>>, vector<8x256xf32>
    %cst_7 = arith.constant dense<0.000000e+00> : vector<8x256xf32>
    %5 = tpu.matmul %3, %4, %cst_7 {dimension_numbers = #tpu.dot_dimension_numbers<[1], [0], [0], [1], [0, 0, 1, 1], [], []>} : vector<8x8xf32>, vector<8x256xf32>, vector<8x256xf32> -> vector<8x256xf32>
    %6 = arith.addf %2, %5 : vector<8x256xf32>
    %c0_8 = arith.constant 0 : index
    %c0_9 = arith.constant 0 : index
    %7 = vector.load %arg5[%c0_8, %c0_9] : memref<1x256xf32, #tpu.memory_space<vmem>>, vector<1x256xf32>
    %8 = vector.broadcast %7 : vector<1x256xf32> to vector<8x256xf32>
    %9 = arith.addf %6, %8 : vector<8x256xf32>
    %cst_10 = arith.constant 0.000000e+00 : f32
    %10 = vector.broadcast %cst_10 : f32 to vector<8x256xf32>
    %11 = arith.maximumf %9, %10 : vector<8x256xf32>
    %c0_11 = arith.constant 0 : index
    %c0_12 = arith.constant 0 : index
    %12 = vector.load %arg6[%c0_11, %c0_12] : memref<256x256xf32, #tpu.memory_space<vmem>>, vector<256x256xf32>
    %cst_13 = arith.constant dense<0.000000e+00> : vector<8x256xf32>
    %13 = tpu.matmul %11, %12, %cst_13 {dimension_numbers = #tpu.dot_dimension_numbers<[1], [0], [0], [1], [0, 0, 1, 1], [], []>} : vector<8x256xf32>, vector<256x256xf32>, vector<8x256xf32> -> vector<8x256xf32>
    %c0_14 = arith.constant 0 : index
    %c0_15 = arith.constant 0 : index
    %14 = vector.load %arg7[%c0_14, %c0_15] : memref<1x256xf32, #tpu.memory_space<vmem>>, vector<1x256xf32>
    %15 = vector.broadcast %14 : vector<1x256xf32> to vector<8x256xf32>
    %16 = arith.addf %13, %15 : vector<8x256xf32>
    %cst_16 = arith.constant 0.000000e+00 : f32
    %17 = vector.broadcast %cst_16 : f32 to vector<8x256xf32>
    %18 = arith.maximumf %16, %17 : vector<8x256xf32>
    %c0_17 = arith.constant 0 : index
    %c0_18 = arith.constant 0 : index
    %19 = vector.load %arg8[%c0_17, %c0_18] : memref<256x256xf32, #tpu.memory_space<vmem>>, vector<256x256xf32>
    %cst_19 = arith.constant dense<0.000000e+00> : vector<8x256xf32>
    %20 = tpu.matmul %18, %19, %cst_19 {dimension_numbers = #tpu.dot_dimension_numbers<[1], [0], [0], [1], [0, 0, 1, 1], [], []>} : vector<8x256xf32>, vector<256x256xf32>, vector<8x256xf32> -> vector<8x256xf32>
    %c0_20 = arith.constant 0 : index
    %c0_21 = arith.constant 0 : index
    %21 = vector.load %arg9[%c0_20, %c0_21] : memref<1x256xf32, #tpu.memory_space<vmem>>, vector<1x256xf32>
    %22 = vector.broadcast %21 : vector<1x256xf32> to vector<8x256xf32>
    %23 = arith.addf %20, %22 : vector<8x256xf32>
    %cst_22 = arith.constant 0.000000e+00 : f32
    %24 = vector.broadcast %cst_22 : f32 to vector<8x256xf32>
    %25 = arith.maximumf %23, %24 : vector<8x256xf32>
    %c0_23 = arith.constant 0 : index
    %c0_24 = arith.constant 0 : index
    %26 = vector.load %arg10[%c0_23, %c0_24] : memref<1x256xf32, #tpu.memory_space<vmem>>, vector<1x256xf32>
    %27 = vector.broadcast %26 : vector<1x256xf32> to vector<8x256xf32>
    %28 = arith.mulf %25, %27 : vector<8x256xf32>
    %cst_25 = arith.constant dense<0.000000e+00> : vector<8xf32>
    %29 = vector.multi_reduction <add>, %28, %cst_25 [1] : vector<8x256xf32> to vector<8xf32>
    %30 = vector.shape_cast %29 : vector<8xf32> to vector<8x1xf32>
    %c0_26 = arith.constant 0 : index
    %c0_27 = arith.constant 0 : index
    %31 = memref.load %arg11[%c0_26, %c0_27] : memref<1x1xf32, #tpu.memory_space<smem>>
    %32 = vector.broadcast %31 : f32 to vector<8x1xf32>
    %33 = arith.addf %30, %32 : vector<8x1xf32>
    %c0_28 = arith.constant 0 : index
    %c0_29 = arith.constant 0 : index
    %34 = vector.load %arg12[%c0_28, %c0_29] : memref<8x1xf32, #tpu.memory_space<vmem>>, vector<8x1xf32>
    tpu.vector_store %arg12[%c0_28, %c0_29], %33 {strides = array<i32>} : memref<8x1xf32, #tpu.memory_space<vmem>>, vector<8x1xf32>,
    return
  }
  func.func @transform_0(%arg0: i32) -> (i32, i32) {
    %c0_i32 = arith.constant 0 : i32
    %c0_i32_0 = arith.constant 0 : i32
    return %arg0, %c0_i32 : i32, i32
  }
  func.func @transform_1(%arg0: i32) -> (i32, i32) {
    %c0_i32 = arith.constant 0 : i32
    %c0_i32_0 = arith.constant 0 : i32
    return %arg0, %c0_i32 : i32, i32
  }
  func.func @transform_2(%arg0: i32) -> (i32, i32) {
    %c0_i32 = arith.constant 0 : i32
    %c0_i32_0 = arith.constant 0 : i32
    %c0_i32_1 = arith.constant 0 : i32
    return %c0_i32, %c0_i32_0 : i32, i32
  }
  func.func @transform_3(%arg0: i32) -> (i32, i32) {
    %c0_i32 = arith.constant 0 : i32
    %c0_i32_0 = arith.constant 0 : i32
    %c0_i32_1 = arith.constant 0 : i32
    return %c0_i32, %c0_i32_0 : i32, i32
  }
  func.func @transform_4(%arg0: i32) -> (i32, i32) {
    %c0_i32 = arith.constant 0 : i32
    %c0_i32_0 = arith.constant 0 : i32
    %c0_i32_1 = arith.constant 0 : i32
    return %c0_i32, %c0_i32_0 : i32, i32
  }
  func.func @transform_5(%arg0: i32) -> (i32, i32) {
    %c0_i32 = arith.constant 0 : i32
    %c0_i32_0 = arith.constant 0 : i32
    %c0_i32_1 = arith.constant 0 : i32
    return %c0_i32, %c0_i32_0 : i32, i32
  }
  func.func @transform_6(%arg0: i32) -> (i32, i32) {
    %c0_i32 = arith.constant 0 : i32
    %c0_i32_0 = arith.constant 0 : i32
    %c0_i32_1 = arith.constant 0 : i32
    return %c0_i32, %c0_i32_0 : i32, i32
  }
  func.func @transform_7(%arg0: i32) -> (i32, i32) {
    %c0_i32 = arith.constant 0 : i32
    %c0_i32_0 = arith.constant 0 : i32
    %c0_i32_1 = arith.constant 0 : i32
    return %c0_i32, %c0_i32_0 : i32, i32
  }
  func.func @transform_8(%arg0: i32) -> (i32, i32) {
    %c0_i32 = arith.constant 0 : i32
    %c0_i32_0 = arith.constant 0 : i32
    %c0_i32_1 = arith.constant 0 : i32
    return %c0_i32, %c0_i32_0 : i32, i32
  }
  func.func @transform_9(%arg0: i32) -> (i32, i32) {
    %c0_i32 = arith.constant 0 : i32
    %c0_i32_0 = arith.constant 0 : i32
    %c0_i32_1 = arith.constant 0 : i32
    return %c0_i32, %c0_i32_0 : i32, i32
  }
  func.func @transform_10(%arg0: i32) -> (i32, i32) {
    %c0_i32 = arith.constant 0 : i32
    %c0_i32_0 = arith.constant 0 : i32
    %c0_i32_1 = arith.constant 0 : i32
    return %c0_i32, %c0_i32_0 : i32, i32
  }
  func.func @transform_11(%arg0: i32) -> (i32, i32) {
    %c0_i32 = arith.constant 0 : i32
    %c0_i32_0 = arith.constant 0 : i32
    return %arg0, %c0_i32 : i32, i32
  }
}

</mosaic_0001>

<bundles_post_ra>
// kernel: critic_forward.1
= control target key start
LH: loop header
LB: loop body
LE: loop exit
PB: predicated region body
PF: predicated region fallthrough
CT: control target
= control target key end

     0   :  { %17 = vsyncpa [#allocation4], 0  ;;  %s1086_s0 = inlined_call_operand.hbm [shape: f32[8,24], index: 0, kind: input, shape index: {}]   ;;  %s1087_s1 = inlined_call_operand.hbm [shape: f32[8,8], index: 1, kind: input, shape index: {}]   ;;  %s1088_s2 = inlined_call_operand.hbm [shape: f32[24,256], index: 2, kind: input, shape index: {}]   ;;  %s1089_s3 = inlined_call_operand.hbm [shape: f32[8,256], index: 3, kind: input, shape index: {}]   ;;  %s1090_s4 = inlined_call_operand.vmem [shape: f32[1,256], index: 4, kind: input, shape index: {}]   ;;  %s1091_s5 = inlined_call_operand.hbm [shape: f32[256,256], index: 5, kind: input, shape index: {}]   ;;  %s1092_s6 = inlined_call_operand.vmem [shape: f32[1,256], index: 6, kind: input, shape index: {}]   ;;  %s1093_s7 = inlined_call_operand.hbm [shape: f32[256,256], index: 7, kind: input, shape index: {}]   ;;  %s1094_s8 = inlined_call_operand.vmem [shape: f32[1,256], index: 8, kind: input, shape index: {}]   ;;  %s1095_s9 = inlined_call_operand.vmem [shape: f32[1,256], index: 9, kind: input, shape index: {}]   ;;  %s1096_s10 = inlined_call_operand.<no memory space> [shape: f32[1,1], index: 10, kind: input, shape index: {}]   ;;  %s1097_s11 = inlined_call_operand.vmem [shape: f32[8,1], index: 11, kind: output, shape index: {}]  }
   0x1   :  { %18 = vsyncpa [#allocation6], 0 }
   0x2   :  { %19 = vsyncpa [#allocation9], 0 }
   0x3   :  { %20 = vsyncpa [#allocation12], 0  ;;  %s904_s17 = smov [#allocation5]   ;;  %s905_s19 = smov [#allocation8]  }
   0x4   :  { %s37_s18 = sshll.u32 %s904_s17, 4  ;;  %s59_s20 = sshll.u32 %s905_s19, 4  ;;  %s38_s18 = int_to_ptr.vmem [resolvable:$true] %s37_s18  ;;  %s60_s20 = int_to_ptr.vmem [resolvable:$true] %s59_s20 }
   0x5   :  { %s764_s23 = scalar_lea.hbm %s1087_s1, 128 }
   0x6   :  { %p765_p0 = scmp.ne.s32.totalorder %s1087_s1, %s764_s23  ;;  %p768_p1 = scmp.lt.u32.totalorder %s764_s23, %s1087_s1 }
   0x8   :  { %p770_p2 = pnand %p768_p1, %p765_p0 }
   0xa   :  { %773 = shalt.err (!%p770_p2)
}
   0xb   :  { %s774_s28 = scalar_lea.vmem %s38_s18, 128  ;;  %p779_p4 = scmp.lt.s32.totalorder %s38_s18, %s38_s18 }
   0xc   :  { %p775_p3 = scmp.ne.s32.totalorder %s38_s18, %s774_s28  ;;  %p780_p5 = scmp.lt.s32.totalorder %s774_s28, %s774_s28 }
   0xe   :  { %p781_p6 = por %p780_p5, %p779_p4 }
  0x10   :  { %p782_p7 = pnand %p781_p6, %p775_p3 }
  0x12   :  { %785 = shalt.err (!%p782_p7)
}
  0x13   :  { %40 = dma.hbm_to_vmem [thread:$0]  %s1087_s1, 128, %s38_s18, [#allocation6]  }
  0x14   :  { %s786_s14 = scalar_lea.hbm %s1089_s3, 256 }
  0x15   :  { %p787_p8 = scmp.ne.s32.totalorder %s1089_s3, %s786_s14  ;;  %p790_p9 = scmp.lt.u32.totalorder %s786_s14, %s1089_s3 }
  0x17   :  { %p792_p10 = pnand %p790_p9, %p787_p8 }
  0x19   :  { %795 = shalt.err (!%p792_p10)
}
  0x1a   :  { %s796_s21 = scalar_lea.vmem %s60_s20, 256  ;;  %p801_p12 = scmp.lt.s32.totalorder %s60_s20, %s60_s20 }
  0x1b   :  { %p797_p11 = scmp.ne.s32.totalorder %s60_s20, %s796_s21  ;;  %p802_p13 = scmp.lt.s32.totalorder %s796_s21, %s796_s21 }
  0x1d   :  { %p803_p0 = por %p802_p13, %p801_p12 }
  0x1f   :  { %p804_p1 = pnand %p803_p0, %p797_p11 }
  0x21   :  { %807 = shalt.err (!%p804_p1)
}
  0x22   :  { %62 = dma.hbm_to_vmem [thread:$0]  %s1089_s3, 256, %s60_s20, [#allocation9]  }
  0x23   :  { %s906_s22 = smov [#allocation3]   ;;  %s907_s24 = smov [#allocation7]  }
  0x24   :  { %s27_s23 = sshll.u32 %s906_s22, 4  ;;  %s46_s25 = sshll.u32 %s907_s24, 4  ;;  %s28_s23 = int_to_ptr.vmem [resolvable:$true] %s27_s23  ;;  %s997_s25 = int_to_ptr.vmem [resolvable:$true] %s46_s25 }
  0x25   :  { %s808_s28 = scalar_lea.hbm %s1086_s0, 128 }
  0x26   :  { %p809_p2 = scmp.ne.s32.totalorder %s1086_s0, %s808_s28  ;;  %p812_p3 = scmp.lt.u32.totalorder %s808_s28, %s1086_s0 }
  0x28   :  { %p814_p4 = pnand %p812_p3, %p809_p2 }
  0x2a   :  { %817 = shalt.err (!%p814_p4)
}
  0x2b   :  { %s818_s3 = scalar_lea.vmem %s28_s23, 128  ;;  %p823_p6 = scmp.lt.s32.totalorder %s28_s23, %s28_s23 }
  0x2c   :  { %p819_p5 = scmp.ne.s32.totalorder %s28_s23, %s818_s3  ;;  %p824_p7 = scmp.lt.s32.totalorder %s818_s3, %s818_s3 }
  0x2e   :  { %p825_p8 = por %p824_p7, %p823_p6 }
  0x30   :  { %p826_p9 = pnand %p825_p8, %p819_p5 }
  0x32   :  { %829 = shalt.err (!%p826_p9)
}
  0x33   :  { %30 = dma.hbm_to_vmem [thread:$0]  %s1086_s0, 128, %s28_s23, [#allocation4]  }
  0x34   :  { %s830_s17 = scalar_lea.hbm %s1088_s2, 768 }
  0x35   :  { %p831_p10 = scmp.ne.s32.totalorder %s1088_s2, %s830_s17  ;;  %p834_p11 = scmp.lt.u32.totalorder %s830_s17, %s1088_s2 }
  0x37   :  { %p836_p12 = pnand %p834_p11, %p831_p10 }
  0x39   :  { %839 = shalt.err (!%p836_p12)
}
  0x3a   :  { %s840_s22 = scalar_lea.vmem %s997_s25, 768  ;;  %p845_p0 = scmp.lt.s32.totalorder %s997_s25, %s997_s25 }
  0x3b   :  { %p841_p13 = scmp.ne.s32.totalorder %s997_s25, %s840_s22  ;;  %p846_p1 = scmp.lt.s32.totalorder %s840_s22, %s840_s22 }
  0x3d   :  { %p847_p2 = por %p846_p1, %p845_p0 }
  0x3f   :  { %p848_p3 = pnand %p847_p2, %p841_p13 }
  0x41   :  { %851 = shalt.err (!%p848_p3)
}
  0x42   :  { %s908_s0 = smov 256   ;;  %s909_s23 = smov 16  }
  0x43   :  { %52 = dma.hbm_to_vmem [thread:$0]  %s1088_s2, 768, %s997_s25, [#allocation6], %s908_s0, %s908_s0, %s909_s23  }
  0x44   :  { %s910_s27 = smov [#allocation10]   ;;  %s911_s29 = smov [#allocation11]  }
  0x45   :  { %s70_s28 = sshll.u32 %s910_s27, 4  ;;  %s84_s30 = sshll.u32 %s911_s29, 4  ;;  %s71_s28 = int_to_ptr.vmem [resolvable:$true] %s70_s28  ;;  %s1031_s30 = int_to_ptr.vmem [resolvable:$true] %s84_s30 }
  0x46   :  { %s852_s3 = scalar_lea.hbm %s1091_s5, 8192 }
  0x47   :  { %p853_p4 = scmp.ne.s32.totalorder %s1091_s5, %s852_s3  ;;  %p856_p5 = scmp.lt.u32.totalorder %s852_s3, %s1091_s5 }
  0x49   :  { %p858_p6 = pnand %p856_p5, %p853_p4 }
  0x4b   :  { %861 = shalt.err (!%p858_p6)
}
  0x4c   :  { %s862_s2 = scalar_lea.vmem %s71_s28, 8192  ;;  %p867_p8 = scmp.lt.s32.totalorder %s71_s28, %s71_s28 }
  0x4d   :  { %p863_p7 = scmp.ne.s32.totalorder %s71_s28, %s862_s2  ;;  %p868_p9 = scmp.lt.s32.totalorder %s862_s2, %s862_s2 }
  0x4f   :  { %p869_p10 = por %p868_p9, %p867_p8 }
  0x51   :  { %p870_p11 = pnand %p869_p10, %p863_p7 }
  0x53   :  { %873 = shalt.err (!%p870_p11)
}
  0x54   :  { %76 = dma.hbm_to_vmem [thread:$0]  %s1091_s5, 8192, %s71_s28, [#allocation9], %s908_s0, %s908_s0, %s909_s23  }
  0x55   :  { %s874_s1 = scalar_lea.hbm %s1093_s7, 8192 }
  0x56   :  { %p875_p12 = scmp.ne.s32.totalorder %s1093_s7, %s874_s1  ;;  %p878_p13 = scmp.lt.u32.totalorder %s874_s1, %s1093_s7 }
  0x58   :  { %p880_p0 = pnand %p878_p13, %p875_p12 }
  0x5a   :  { %883 = shalt.err (!%p880_p0)
}
  0x5b   :  { %s884_s27 = scalar_lea.vmem %s1031_s30, 8192  ;;  %p889_p2 = scmp.lt.s32.totalorder %s1031_s30, %s1031_s30 }
  0x5c   :  { %p885_p1 = scmp.ne.s32.totalorder %s1031_s30, %s884_s27  ;;  %p890_p3 = scmp.lt.s32.totalorder %s884_s27, %s884_s27 }
  0x5e   :  { %p891_p4 = por %p890_p3, %p889_p2 }
  0x60   :  { %p892_p5 = pnand %p891_p4, %p885_p1 }
  0x62   :  { %895 = shalt.err (!%p892_p5)
}
  0x63   :  { %90 = dma.hbm_to_vmem [thread:$0]  %s1093_s7, 8192, %s1031_s30, [#allocation12], %s908_s0, %s908_s0, %s909_s23  }
  0x64   :  { %896 = dma.done.wait [#allocation4], 128  }
  0x65   :  { %897 = vsyncadd [#allocation4], 4294967168 }
  0x66   :  { %898 = dma.done.wait [#allocation6], 896  }
  0x67   :  { %899 = vsyncadd [#allocation6], 4294966400 }
  0x68   :  { %900 = dma.done.wait [#allocation9], 8448  }
  0x69   :  { %901 = vsyncadd [#allocation9], 4294958848 }
  0x6a   :  { %902 = dma.done.wait [#allocation12], 8192  }
  0x6b   :  { %903 = vsyncadd [#allocation12], 4294959104  ;;  %v912_v0 = vmov 0.0   ;;  %v117_v1 = vld [vmem:[#allocation7 + $0x8] sm:$0xff]  ;;  %v119_v2 = vld [vmem:[#allocation7 + $0x18] sm:$0xff]  ;;  %vm125_vm0 = vcmask 64512  }
  0x6c   :  { %193 = vmatprep.mubr.f32.mxu1 %v912_v0  ;;  %268 = vmatprep.mubr.f32.mxu0 %v912_v0  ;;  %v116_v3 = vld [vmem:[#allocation7] sm:$0xff]  ;;  %v621_v4 = vpack.c.bf16 %v119_v2, %v117_v1  ;;  %v118_v5 = vld [vmem:[#allocation7 + $0x10] sm:$0xff]  ;;  %v124_v6 = vld [vmem:[#allocation8 + $0x8] sm:$0xff]  ;;  %vm200_vm1 = vcmask 195584   ;;  %vm609_vm2 = vcmask 7168  }
  0x6d   :  { %v123_v7 = vld [vmem:[#allocation8] sm:$0xff]  ;;  %v623_v8 = vpack.c.bf16 %v118_v5, %v116_v3  ;;  %129 = vmatprep.subr.mxu1 %v124_v6  ;;  %v121_v9 = vld [vmem:[#allocation7 + $0x28] sm:$0xff]  ;;  %v122_v10 = vld [vmem:[#allocation5] sm:$0xff] }
  0x6e   :  { %622 = vmatprep.subr.bf16.mxu0 %v621_v4  ;;  %130 = vmatpush1.msra.mxu1 %v123_v7  ;;  %v120_v11 = vld [vmem:[#allocation7 + $0x20] sm:$0xff]  ;;  %v292_v12 = vld [vmem:[#allocation10 + $0x8] sm:$0xff]  ;;  %v294_v13 = vld [vmem:[#allocation10 + $0x18] sm:$0xff] }
  0x6f   :  { %624 = vmatpush1.bf16.msra.mxu0 %v623_v8  ;;  %619 = vmatmul.mubr.msk.f32.vlgmr.msra.gmra.mrb[0].mxu1 %vm125_vm0, %v122_v10  ;;  %v625_v14 = vpack.c.bf16 %v294_v13, %v292_v12  ;;  %v291_v15 = vld [vmem:[#allocation10] sm:$0xff]  ;;  %v293_v16 = vld [vmem:[#allocation10 + $0x10] sm:$0xff]  ;;  %v296_v17 = vld [vmem:[#allocation10 + $0x28] sm:$0xff] }
  0x70   :  { %208 = vmatprep.subr.mxu0 %v121_v9  ;;  %v627_v18 = vpack.c.bf16 %v293_v16, %v291_v15  ;;  %v298_v19 = vld [vmem:[#allocation10 + $0x38] sm:$0xff]  ;;  %v295_v20 = vld [vmem:[#allocation10 + $0x20] sm:$0xff]  ;;  %v297_v21 = vld [vmem:[#allocation10 + $0x30] sm:$0xff] }
  0x71   :  { %v115_v22 = vld [vmem:[#allocation3] sm:$0xff]  ;;  %626 = vmatprep.subr.bf16.mxu1 %v625_v14  ;;  %v629_v23 = vpack.c.bf16 %v298_v19, %v296_v17  ;;  %v300_v24 = vld [vmem:[#allocation10 + $0x48] sm:$0xff]  ;;  %v302_v25 = vld [vmem:[#allocation10 + $0x58] sm:$0xff]  ;;  %v631_v26 = vpack.c.bf16 %v297_v21, %v295_v20 }
  0x72   :  { %628 = vmatpush1.bf16.msra.mxu1 %v627_v18  ;;  %v633_v27 = vpack.c.bf16 %v302_v25, %v300_v24  ;;  %v299_v28 = vld [vmem:[#allocation10 + $0x40] sm:$0xff]  ;;  %v301_v29 = vld [vmem:[#allocation10 + $0x50] sm:$0xff]  ;;  %v304_v30 = vld [vmem:[#allocation10 + $0x68] sm:$0xff] }
  0x73   :  { %209 = vmatpush1.msra.mxu0 %v120_v11  ;;  %630 = vmatprep.subr.bf16.mxu1 %v629_v23  ;;  %v306_v31 = vld [vmem:[#allocation10 + $0x78] sm:$0xff]  ;;  %v635_v32 = vpack.c.bf16 %v301_v29, %v299_v28  ;;  %v303_v34 = vld [vmem:[#allocation10 + $0x60] sm:$0xff]  ;;  %v305_v35 = vld [vmem:[#allocation10 + $0x70] sm:$0xff] }
  0x74   :  { %620 = vmatmul.mubr.msk.f32.vlgmr.msra.gmra.mrb[0].mxu0 %vm200_vm1, %v115_v22  ;;  %v637_v33 = vpack.c.bf16 %v306_v31, %v304_v30  ;;  %v308_v36 = vld [vmem:[#allocation10 + $0x88] sm:$0xff]  ;;  %v310_v37 = vld [vmem:[#allocation10 + $0x98] sm:$0xff]  ;;  %v639_v38 = vpack.c.bf16 %v305_v35, %v303_v34  ;;  %v307_v40 = vld [vmem:[#allocation10 + $0x80] sm:$0xff] }
  0x75   :  { %v641_v39 = vpack.c.bf16 %v310_v37, %v308_v36  ;;  %v309_v41 = vld [vmem:[#allocation10 + $0x90] sm:$0xff]  ;;  %v312_v42 = vld [vmem:[#allocation10 + $0xa8] sm:$0xff]  ;;  %v314_v43 = vld [vmem:[#allocation10 + $0xb8] sm:$0xff] }
  0x76   :  { %632 = vmatpush1.bf16.msra.mxu1 %v631_v26  ;;  %v643_v44 = vpack.c.bf16 %v309_v41, %v307_v40  ;;  %v645_v45 = vpack.c.bf16 %v314_v43, %v312_v42  ;;  %v311_v46 = vld [vmem:[#allocation10 + $0xa0] sm:$0xff]  ;;  %v313_v47 = vld [vmem:[#allocation10 + $0xb0] sm:$0xff]  ;;  %v316_v48 = vld [vmem:[#allocation10 + $0xc8] sm:$0xff] }
  0x77   :  { %634 = vmatprep.subr.bf16.mxu1 %v633_v27  ;;  %v318_v49 = vld [vmem:[#allocation10 + $0xd8] sm:$0xff]  ;;  %v647_v50 = vpack.c.bf16 %v313_v47, %v311_v46  ;;  %v315_v52 = vld [vmem:[#allocation10 + $0xc0] sm:$0xff]  ;;  %v317_v53 = vld [vmem:[#allocation10 + $0xd0] sm:$0xff] }
  0x78   :  { %v649_v51 = vpack.c.bf16 %v318_v49, %v316_v48  ;;  %v320_v54 = vld [vmem:[#allocation10 + $0xe8] sm:$0xff]  ;;  %v322_v55 = vld [vmem:[#allocation10 + $0xf8] sm:$0xff]  ;;  %v651_v56 = vpack.c.bf16 %v317_v53, %v315_v52  ;;  %v319_v58 = vld [vmem:[#allocation10 + $0xe0] sm:$0xff] }
  0x79   :  { %v653_v57 = vpack.c.bf16 %v322_v55, %v320_v54  ;;  %v321_v59 = vld [vmem:[#allocation10 + $0xf0] sm:$0xff]  ;;  %v324_v60 = vld [vmem:[#allocation10 + $0x108] sm:$0xff]  ;;  %v326_v61 = vld [vmem:[#allocation10 + $0x118] sm:$0xff] }
  0x7a   :  { %636 = vmatpush1.bf16.msra.mxu1 %v635_v32  ;;  %v655_v62 = vpack.c.bf16 %v321_v59, %v319_v58  ;;  %v657_v63 = vpack.c.bf16 %v326_v61, %v324_v60  ;;  %v323_v0 = vld [vmem:[#allocation10 + $0x100] sm:$0xff]  ;;  %v325_v1 = vld [vmem:[#allocation10 + $0x110] sm:$0xff]  ;;  %v328_v2 = vld [vmem:[#allocation10 + $0x128] sm:$0xff] }
  0x7b   :  { %638 = vmatprep.subr.bf16.mxu1 %v637_v33  ;;  %v330_v3 = vld [vmem:[#allocation10 + $0x138] sm:$0xff]  ;;  %v659_v4 = vpack.c.bf16 %v325_v1, %v323_v0  ;;  %v327_v6 = vld [vmem:[#allocation10 + $0x120] sm:$0xff]  ;;  %v329_v7 = vld [vmem:[#allocation10 + $0x130] sm:$0xff] }
  0x7c   :  { %v661_v5 = vpack.c.bf16 %v330_v3, %v328_v2  ;;  %v332_v8 = vld [vmem:[#allocation10 + $0x148] sm:$0xff]  ;;  %v334_v9 = vld [vmem:[#allocation10 + $0x158] sm:$0xff]  ;;  %v663_v10 = vpack.c.bf16 %v329_v7, %v327_v6  ;;  %v331_v12 = vld [vmem:[#allocation10 + $0x140] sm:$0xff] }
  0x7d   :  { %v665_v11 = vpack.c.bf16 %v334_v9, %v332_v8  ;;  %v333_v13 = vld [vmem:[#allocation10 + $0x150] sm:$0xff]  ;;  %v336_v14 = vld [vmem:[#allocation10 + $0x168] sm:$0xff]  ;;  %v338_v15 = vld [vmem:[#allocation10 + $0x178] sm:$0xff] }
  0x7e   :  { %640 = vmatpush1.bf16.msra.mxu1 %v639_v38  ;;  %v667_v16 = vpack.c.bf16 %v333_v13, %v331_v12  ;;  %v669_v17 = vpack.c.bf16 %v338_v15, %v336_v14  ;;  %v335_v18 = vld [vmem:[#allocation10 + $0x160] sm:$0xff]  ;;  %v337_v19 = vld [vmem:[#allocation10 + $0x170] sm:$0xff]  ;;  %v340_v20 = vld [vmem:[#allocation10 + $0x188] sm:$0xff] }
  0x7f   :  { %642 = vmatprep.subr.bf16.mxu1 %v641_v39  ;;  %v342_v21 = vld [vmem:[#allocation10 + $0x198] sm:$0xff]  ;;  %v671_v22 = vpack.c.bf16 %v337_v19, %v335_v18  ;;  %v339_v24 = vld [vmem:[#allocation10 + $0x180] sm:$0xff]  ;;  %v341_v25 = vld [vmem:[#allocation10 + $0x190] sm:$0xff] }
  0x80   :  { %v673_v23 = vpack.c.bf16 %v342_v21, %v340_v20  ;;  %v344_v26 = vld [vmem:[#allocation10 + $0x1a8] sm:$0xff]  ;;  %v346_v27 = vld [vmem:[#allocation10 + $0x1b8] sm:$0xff]  ;;  %v675_v28 = vpack.c.bf16 %v341_v25, %v339_v24  ;;  %v343_v30 = vld [vmem:[#allocation10 + $0x1a0] sm:$0xff] }
  0x81   :  { %v677_v29 = vpack.c.bf16 %v346_v27, %v344_v26  ;;  %v345_v31 = vld [vmem:[#allocation10 + $0x1b0] sm:$0xff]  ;;  %v348_v33 = vld [vmem:[#allocation10 + $0x1c8] sm:$0xff]  ;;  %v350_v34 = vld [vmem:[#allocation10 + $0x1d8] sm:$0xff] }
  0x82   :  { %644 = vmatpush1.bf16.msra.mxu1 %v643_v44  ;;  %v679_v32 = vpack.c.bf16 %v345_v31, %v343_v30  ;;  %v681_v35 = vpack.c.bf16 %v350_v34, %v348_v33  ;;  %v347_v36 = vld [vmem:[#allocation10 + $0x1c0] sm:$0xff]  ;;  %v349_v37 = vld [vmem:[#allocation10 + $0x1d0] sm:$0xff]  ;;  %v352_v39 = vld [vmem:[#allocation10 + $0x1e8] sm:$0xff] }
  0x83   :  { %646 = vmatprep.subr.bf16.mxu1 %v645_v45  ;;  %v683_v38 = vpack.c.bf16 %v349_v37, %v347_v36  ;;  %v354_v40 = vld [vmem:[#allocation10 + $0x1f8] sm:$0xff]  ;;  %v351_v42 = vld [vmem:[#allocation10 + $0x1e0] sm:$0xff]  ;;  %v353_v43 = vld [vmem:[#allocation10 + $0x1f0] sm:$0xff] }
  0x84   :  { %v685_v41 = vpack.c.bf16 %v354_v40, %v352_v39  ;;  %v687_v44 = vpack.c.bf16 %v353_v43, %v351_v42  ;;  %v441_v45 = vld [vmem:[#allocation11 + $0x8] sm:$0xff]  ;;  %v443_v46 = vld [vmem:[#allocation11 + $0x18] sm:$0xff]  ;;  %v440_v47 = vld [vmem:[#allocation11] sm:$0xff] }
  0x85   :  { %v689_v48 = vpack.c.bf16 %v443_v46, %v441_v45  ;;  %v442_v49 = vld [vmem:[#allocation11 + $0x10] sm:$0xff]  ;;  %v444_v54 = vld [vmem:[#allocation11 + $0x20] sm:$0xff]  ;;  %v477_v34 = vld [vmem:[#allocation11 + $0x128] sm:$0xff] }
  0x86   :  { %648 = vmatpush1.bf16.msra.mxu1 %v647_v50  ;;  %v445_v50 = vld [vmem:[#allocation11 + $0x28] sm:$0xff]  ;;  %v691_v52 = vpack.c.bf16 %v442_v49, %v440_v47  ;;  %v446_v55 = vld [vmem:[#allocation11 + $0x30] sm:$0xff]  ;;  %v448_v60 = vld [vmem:[#allocation11 + $0x40] sm:$0xff] }
  0x87   :  { %650 = vmatprep.subr.bf16.mxu1 %v649_v51  ;;  %v447_v51 = vld [vmem:[#allocation11 + $0x38] sm:$0xff]  ;;  %690 = vmatprep.subr.bf16.mxu0 %v689_v48  ;;  %v695_v58 = vpack.c.bf16 %v446_v55, %v444_v54  ;;  %v450_v61 = vld [vmem:[#allocation11 + $0x50] sm:$0xff]  ;;  %v452_v2 = vld [vmem:[#allocation11 + $0x60] sm:$0xff] }
  0x88   :  { %v693_v53 = vpack.c.bf16 %v447_v51, %v445_v50  ;;  %692 = vmatpush1.bf16.msra.mxu0 %v691_v52  ;;  %v699_v0 = vpack.c.bf16 %v450_v61, %v448_v60  ;;  %v454_v3 = vld [vmem:[#allocation11 + $0x70] sm:$0xff]  ;;  %v456_v8 = vld [vmem:[#allocation11 + $0x80] sm:$0xff]  ;;  %v481_v40 = vld [vmem:[#allocation11 + $0x148] sm:$0xff] }
  0x89   :  { %v703_v6 = vpack.c.bf16 %v454_v3, %v452_v2  ;;  %v458_v9 = vld [vmem:[#allocation11 + $0x90] sm:$0xff]  ;;  %v460_v14 = vld [vmem:[#allocation11 + $0xa0] sm:$0xff]  ;;  %v485_v46 = vld [vmem:[#allocation11 + $0x168] sm:$0xff] }
  0x8a   :  { %652 = vmatpush1.bf16.msra.mxu1 %v651_v56  ;;  %v449_v56 = vld [vmem:[#allocation11 + $0x48] sm:$0xff]  ;;  %694 = vmatprep.subr.bf16.mxu0 %v693_v53  ;;  %v707_v12 = vpack.c.bf16 %v458_v9, %v456_v8  ;;  %v462_v15 = vld [vmem:[#allocation11 + $0xb0] sm:$0xff]  ;;  %v464_v20 = vld [vmem:[#allocation11 + $0xc0] sm:$0xff] }
  0x8b   :  { %654 = vmatprep.subr.bf16.mxu1 %v653_v57  ;;  %v451_v57 = vld [vmem:[#allocation11 + $0x58] sm:$0xff]  ;;  %v711_v18 = vpack.c.bf16 %v462_v15, %v460_v14  ;;  %v466_v21 = vld [vmem:[#allocation11 + $0xd0] sm:$0xff]  ;;  %v468_v26 = vld [vmem:[#allocation11 + $0xe0] sm:$0xff] }
  0x8c   :  { %v697_v59 = vpack.c.bf16 %v451_v57, %v449_v56  ;;  %696 = vmatpush1.bf16.msra.mxu0 %v695_v58  ;;  %v715_v24 = vpack.c.bf16 %v466_v21, %v464_v20  ;;  %v470_v27 = vld [vmem:[#allocation11 + $0xf0] sm:$0xff]  ;;  %v487_v47 = vld [vmem:[#allocation11 + $0x178] sm:$0xff]  ;;  %v484_v50 = vld [vmem:[#allocation11 + $0x160] sm:$0xff] }
  0x8d   :  { %v719_v30 = vpack.c.bf16 %v470_v27, %v468_v26  ;;  %v474_v33 = vld [vmem:[#allocation11 + $0x110] sm:$0xff]  ;;  %v733_v49 = vpack.c.bf16 %v487_v47, %v485_v46  ;;  %v489_v52 = vld [vmem:[#allocation11 + $0x188] sm:$0xff]  ;;  %v491_v53 = vld [vmem:[#allocation11 + $0x198] sm:$0xff] }
  0x8e   :  { %656 = vmatpush1.bf16.msra.mxu1 %v655_v62  ;;  %v453_v62 = vld [vmem:[#allocation11 + $0x68] sm:$0xff]  ;;  %698 = vmatprep.subr.bf16.mxu0 %v697_v59  ;;  %v478_v39 = vld [vmem:[#allocation11 + $0x130] sm:$0xff]  ;;  %v737_v55 = vpack.c.bf16 %v491_v53, %v489_v52  ;;  %v488_v56 = vld [vmem:[#allocation11 + $0x180] sm:$0xff] }
  0x8f   :  { %658 = vmatprep.subr.bf16.mxu1 %v657_v63  ;;  %v455_v63 = vld [vmem:[#allocation11 + $0x78] sm:$0xff]  ;;  %v482_v45 = vld [vmem:[#allocation11 + $0x150] sm:$0xff]  ;;  %v493_v58 = vld [vmem:[#allocation11 + $0x1a8] sm:$0xff] }
  0x90   :  { %v701_v1 = vpack.c.bf16 %v455_v63, %v453_v62  ;;  %700 = vmatpush1.bf16.msra.mxu0 %v699_v0  ;;  %v486_v51 = vld [vmem:[#allocation11 + $0x170] sm:$0xff]  ;;  %v495_v59 = vld [vmem:[#allocation11 + $0x1b8] sm:$0xff]  ;;  %v492_v62 = vld [vmem:[#allocation11 + $0x1a0] sm:$0xff] }
  0x91   :  { %v735_v54 = vpack.c.bf16 %v486_v51, %v484_v50  ;;  %v490_v57 = vld [vmem:[#allocation11 + $0x190] sm:$0xff]  ;;  %v741_v61 = vpack.c.bf16 %v495_v59, %v493_v58  ;;  %v497_v0 = vld [vmem:[#allocation11 + $0x1c8] sm:$0xff]  ;;  %v496_v21 = vld [vmem:[#allocation11 + $0x1c0] sm:$0xff] }
  0x92   :  { %660 = vmatpush1.bf16.msra.mxu1 %v659_v4  ;;  %v457_v4 = vld [vmem:[#allocation11 + $0x88] sm:$0xff]  ;;  %702 = vmatprep.subr.bf16.mxu0 %v701_v1  ;;  %v739_v60 = vpack.c.bf16 %v490_v57, %v488_v56  ;;  %v494_v63 = vld [vmem:[#allocation11 + $0x1b0] sm:$0xff]  ;;  %v499_v1 = vld [vmem:[#allocation11 + $0x1d8] sm:$0xff] }
  0x93   :  { %662 = vmatprep.subr.bf16.mxu1 %v661_v5  ;;  %v459_v5 = vld [vmem:[#allocation11 + $0x98] sm:$0xff]  ;;  %v743_v2 = vpack.c.bf16 %v494_v63, %v492_v62  ;;  %v745_v3 = vpack.c.bf16 %v499_v1, %v497_v0  ;;  %v275_v9 = vld [vmem:[%s1090_s4] sm:$0x3]  ;;  %v500_v27 = vld [vmem:[#allocation11 + $0x1e0] sm:$0xff] }
  0x94   :  { %v705_v7 = vpack.c.bf16 %v459_v5, %v457_v4  ;;  %704 = vmatpush1.bf16.msra.mxu0 %v703_v6  ;;  %v277_v4 = vlaneseq }
  0x96   :  { %664 = vmatpush1.bf16.msra.mxu1 %v663_v10  ;;  %v461_v10 = vld [vmem:[#allocation11 + $0xa8] sm:$0xff]  ;;  %706 = vmatprep.subr.bf16.mxu0 %v705_v7  ;;  %v278_v5 = vshrl.u32 %v277_v4, 7 }
  0x97   :  { %666 = vmatprep.subr.bf16.mxu1 %v665_v11  ;;  %v463_v11 = vld [vmem:[#allocation11 + $0xb8] sm:$0xff] }
  0x98   :  { %v709_v13 = vpack.c.bf16 %v463_v11, %v461_v10  ;;  %708 = vmatpush1.bf16.msra.mxu0 %v707_v12  ;;  %v279_v7 = vsub.s32 0, %v278_v5  ;;  %v283_v10 = vsub.s32 1, %v278_v5 }
  0x9a   :  { %668 = vmatpush1.bf16.msra.mxu1 %v667_v16  ;;  %v465_v16 = vld [vmem:[#allocation11 + $0xc8] sm:$0xff]  ;;  %710 = vmatprep.subr.bf16.mxu0 %v709_v13  ;;  %v280_v11 = vrot.slane %v275_v9, %v279_v7  ;;  %v284_v13 = vrot.slane %v275_v9, %v283_v10 }
  0x9b   :  { %670 = vmatprep.subr.bf16.mxu1 %v669_v17  ;;  %v467_v17 = vld [vmem:[#allocation11 + $0xd8] sm:$0xff] }
  0x9c   :  { %v713_v19 = vpack.c.bf16 %v467_v17, %v465_v16  ;;  %712 = vmatpush1.bf16.msra.mxu0 %v711_v18 }
  0x9e   :  { %672 = vmatpush1.bf16.msra.mxu1 %v671_v22  ;;  %v469_v22 = vld [vmem:[#allocation11 + $0xe8] sm:$0xff]  ;;  %714 = vmatprep.subr.bf16.mxu0 %v713_v19 }
  0x9f   :  { %674 = vmatprep.subr.bf16.mxu1 %v673_v23  ;;  %v471_v23 = vld [vmem:[#allocation11 + $0xf8] sm:$0xff] }
  0xa0   :  { %v717_v25 = vpack.c.bf16 %v471_v23, %v469_v22  ;;  %716 = vmatpush1.bf16.msra.mxu0 %v715_v24  ;;  %v498_v22 = vld [vmem:[#allocation11 + $0x1d0] sm:$0xff]  ;;  %v501_v24 = vld [vmem:[#allocation11 + $0x1e8] sm:$0xff] }
  0xa1   :  { %v747_v23 = vpack.c.bf16 %v498_v22, %v496_v21 }
  0xa2   :  { %676 = vmatpush1.bf16.msra.mxu1 %v675_v28  ;;  %v473_v28 = vld [vmem:[#allocation11 + $0x108] sm:$0xff]  ;;  %718 = vmatprep.subr.bf16.mxu0 %v717_v25  ;;  %v503_v25 = vld [vmem:[#allocation11 + $0x1f8] sm:$0xff] }
  0xa3   :  { %678 = vmatprep.subr.bf16.mxu1 %v677_v29  ;;  %v475_v29 = vld [vmem:[#allocation11 + $0x118] sm:$0xff]  ;;  %v749_v26 = vpack.c.bf16 %v503_v25, %v501_v24 }
  0xa4   :  { %v721_v31 = vpack.c.bf16 %v475_v29, %v473_v28  ;;  %720 = vmatpush1.bf16.msra.mxu0 %v719_v30  ;;  %v502_v28 = vld [vmem:[#allocation11 + $0x1f0] sm:$0xff] }
  0xa5   :  { %v751_v29 = vpack.c.bf16 %v502_v28, %v500_v27  ;;  %v355_v30 = vld [vmem:[%s1092_s6] sm:$0x3] }
  0xa6   :  { %680 = vmatpush1.bf16.msra.mxu1 %v679_v32  ;;  %v472_v32 = vld [vmem:[#allocation11 + $0x100] sm:$0xff]  ;;  %722 = vmatprep.subr.bf16.mxu0 %v721_v31  ;;  %v360_v31 = vrot.slane %v355_v30, %v279_v7 }
  0xa7   :  { %682 = vmatprep.subr.bf16.mxu1 %v681_v35  ;;  %v479_v35 = vld [vmem:[#allocation11 + $0x138] sm:$0xff]  ;;  %v723_v36 = vpack.c.bf16 %v474_v33, %v472_v32  ;;  %v364_v32 = vrot.slane %v355_v30, %v283_v10 }
  0xa8   :  { %v725_v37 = vpack.c.bf16 %v479_v35, %v477_v34 }
  0xa9   :  { %724 = vmatpush1.bf16.msra.mxu0 %v723_v36 }
  0xaa   :  { %684 = vmatpush1.bf16.msra.mxu1 %v683_v38  ;;  %v476_v38 = vld [vmem:[#allocation11 + $0x120] sm:$0xff]  ;;  %726 = vmatprep.subr.bf16.mxu0 %v725_v37 }
  0xab   :  { %686 = vmatprep.subr.bf16.mxu1 %v685_v41  ;;  %v483_v41 = vld [vmem:[#allocation11 + $0x158] sm:$0xff]  ;;  %v727_v42 = vpack.c.bf16 %v478_v39, %v476_v38  ;;  %v504_v39 = vld [vmem:[%s1094_s8] sm:$0x3] }
  0xac   :  { %v729_v43 = vpack.c.bf16 %v483_v41, %v481_v40  ;;  %v509_v40 = vrot.slane %v504_v39, %v279_v7  ;;  %v513_v41 = vrot.slane %v504_v39, %v283_v10 }
  0xad   :  { %728 = vmatpush1.bf16.msra.mxu0 %v727_v42  ;;  %v589_v42 = vld [vmem:[%s1095_s9] sm:$0x3] }
  0xae   :  { %688 = vmatpush1.bf16.msra.mxu1 %v687_v44  ;;  %v480_v44 = vld [vmem:[#allocation11 + $0x140] sm:$0xff]  ;;  %730 = vmatprep.subr.bf16.mxu0 %v729_v43  ;;  %v594_v46 = vrot.slane %v589_v42, %v279_v7 }
  0xaf   :  { %v731_v48 = vpack.c.bf16 %v482_v45, %v480_v44 }
  0xb1   :  { %732 = vmatpush1.bf16.msra.mxu0 %v731_v48  ;;  %v598_v48 = vrot.slane %v589_v42, %v283_v10 }
  0xb2   :  { %734 = vmatprep.subr.bf16.mxu0 %v733_v49 }
  0xb5   :  { %736 = vmatpush1.bf16.msra.mxu0 %v735_v54  ;;  %v607_v54 = vstv %s1096_s10 }
  0xb6   :  { %738 = vmatprep.subr.bf16.mxu0 %v737_v55 }
  0xb9   :  { %740 = vmatpush1.bf16.msra.mxu0 %v739_v60 }
  0xba   :  { %742 = vmatprep.subr.bf16.mxu0 %v741_v61 }
  0xbd   :  { %744 = vmatpush1.bf16.msra.mxu0 %v743_v2 }
  0xbe   :  { %746 = vmatprep.subr.bf16.mxu0 %v745_v3 }
  0xc1   :  { %748 = vmatpush1.bf16.msra.mxu0 %v747_v23 }
  0xc2   :  { %750 = vmatprep.subr.bf16.mxu0 %v749_v26 }
  0xc5   :  { %752 = vmatpush1.bf16.msra.mxu0 %v751_v29 }
 0x142   :  { %v195_v6 = vpop.f32.mrb[0].mxu1 }
 0x143   :  { %v197_v8 = vpop.f32.mrb[1].mxu1 }
 0x147   :  { %v270_v12 = vpop.f32.mrb[0].mxu0 }
 0x148   :  { %v271_v14 = vadd.f32 %v270_v12, %v195_v6  ;;  %v272_v15 = vpop.f32.mrb[1].mxu0 }
 0x149   :  { %v273_v16 = vadd.f32 %v272_v15, %v197_v8 }
 0x14a   :  { %v287_v17 = vadd.f32 %v280_v11, %v271_v14 }
 0x14b   :  { %v288_v18 = vadd.f32 %v284_v13, %v273_v16 }
 0x14c   :  { %v289_v20 = vmax.f32 %v287_v17, 0.0 }
 0x14d   :  { %v290_v19 = vmax.f32 %v288_v18, 0.0 }
 0x14f   :  { %431 = vmatprep.mubr.f32.mxu1 %v290_v19 }
 0x150   :  { %432 = vmatmul.mubr.f32.vlgmr.msra.gmra.mrb[2].mxu1 %v289_v20 }
 0x223   :  { %v433_v33 = vpop.f32.mrb[2].mxu1 }
 0x224   :  { %v434_v34 = vadd.f32 %v433_v33, %v360_v31  ;;  %v435_v35 = vpop.f32.mrb[3].mxu1 }
 0x225   :  { %v436_v36 = vadd.f32 %v435_v35, %v364_v32 }
 0x226   :  { %v438_v38 = vmax.f32 %v434_v34, 0.0 }
 0x227   :  { %v439_v37 = vmax.f32 %v436_v36, 0.0 }
 0x229   :  { %580 = vmatprep.mubr.f32.mxu0 %v439_v37 }
 0x22a   :  { %581 = vmatmul.mubr.f32.vlgmr.msra.gmra.mrb[2].mxu0 %v438_v38 }
 0x2fd   :  { %v582_v43 = vpop.f32.mrb[2].mxu0 }
 0x2fe   :  { %v583_v44 = vadd.f32 %v582_v43, %v509_v40  ;;  %v584_v45 = vpop.f32.mrb[3].mxu0 }
 0x2ff   :  { %v585_v47 = vadd.f32 %v584_v45, %v513_v41 }
 0x300   :  { %v587_v49 = vmax.f32 %v583_v44, 0.0 }
 0x301   :  { %v588_v50 = vmax.f32 %v585_v47, 0.0 }
 0x302   :  { %v601_v51 = vmul.f32 %v594_v46, %v587_v49 }
 0x303   :  { %v602_v52 = vmul.f32 %v598_v48, %v588_v50 }
 0x305   :  { %v603_v53 = vadd.f32 %v602_v52, %v601_v51 }
 0x307   :  { %604 = vadd.xlane.f32.xlu0 %v603_v53 }
 0x394   :  { %v605_v55 = vpop.xlane.xlu0 %604 }
 0x395   :  { %v608_v56 = vadd.f32 %v607_v54, %v605_v55 }
 0x397   :  { %610 = vst.msk [vmem:[%s1097_s11] sm:$0xff] %vm609_vm2, %v608_v56 }
 0x398   :  { %615 = vsyncpa [#allocation4], 1 }
 0x399   :  { %616 = vsyncpa [#allocation6], 1 }
 0x39a   :  { %617 = vsyncpa [#allocation9], 1 }
 0x39b   :  { %618 = vsyncpa [#allocation12], 1 }

</bundles_post_ra>
